<compile_context>
chip_gen: v7x
topology: tpu7x:2x2x1
jax: 0.10.0
libtpu: 0.0.40
codegen_flags: <defaults>
</compile_context>

<pallas_src>
import functools
import math

import jax
import jax.numpy as jnp
from jax.experimental import pallas as pl
from jax.experimental.pallas import tpu as pltpu


# ----------------------------------------------------------------------------
# Pallas kernel: all GRN layers for one block of Bb batch elements
# (feature-major layout, R = Bb*T rows on the lane axis).
# ----------------------------------------------------------------------------
def _grn_fused_kernel(a_ref, h0_ref, fpre_ref, mask_ref, u_ref,
                      reps_ref, c_ref, *, num_layers, hidden_dim):
    D = hidden_dim
    _, R = h0_ref.shape

    # Loop-invariant loads / casts (bf16 MXU operands, f32 accumulation).
    a_cat = a_ref[0]                    # [R, 2R] bf16: block-diag, row-masked, in|out
    u_t = u_ref[...]                    # [4D, 2D] bf16 (= [u_in_h ; u_out_h]^T)
    fpre = fpre_ref[...]                # [4D, R] f32 (layer-invariant pre-activation)
    # Hoisted: JAX does not CSE broadcast_in_dim, so materialize the mask once.
    mask_d = jnp.broadcast_to(mask_ref[...], (D, R))    # [D, R] f32

    h = h0_ref[...]                     # [D, R] f32
    c = jnp.zeros((D, R), jnp.float32)

    # TODO(synk): for num_layers > ~4 switch to lax.fori_loop (dynamic layer
    # index into reps_ref) to bound live ranges; unrolled is best for 2-3.
    for layer in range(num_layers):
        hb = h.astype(jnp.bfloat16)
        # One lane-dense MXU call covers both in- and out-neighbor aggregation
        # (the seq row-mask is already folded into a_cat).
        agg = jnp.dot(hb, a_cat, preferred_element_type=jnp.float32)   # [D, 2R]
        hcat = jnp.concatenate([agg[:, :R], agg[:, R:]], axis=0)       # [2D, R]
        rec = jnp.dot(u_t, hcat.astype(jnp.bfloat16),
                      preferred_element_type=jnp.float32)              # [4D, R]
        pre = fpre + rec

        # Gate slices are sublane slices (multiples of 8), full lane width.
        ingate = jax.nn.sigmoid(pre[0 * D:1 * D, :])
        forgetgate = jax.nn.sigmoid(pre[1 * D:2 * D, :])
        outgate = jax.nn.sigmoid(pre[2 * D:3 * D, :])
        cell_input = jnp.tanh(pre[3 * D:4 * D, :])

        c = forgetgate * c + ingate * cell_input
        h = outgate * jnp.tanh(c) * mask_d
        reps_ref[layer] = h             # per-layer hidden (lane-dense store)

    # Masked rows never feed unmasked rows, so the cell only needs masking
    # once at the end (matches the reference's returned node_cell).
    c_ref[...] = c * mask_d


def _choose_blocks(B, T, target_rows=512):
    """Pick (Bb, G): batch rows per grid step and number of grid steps."""
    if B * T <= max(target_rows, 256):
        return B, 1                     # single block == full arrays
    # Keep the blocked lane dim (Bb*T) a multiple of 128 when the grid tiles it.
    unit = 128 // math.gcd(T, 128)
    Bb = max(unit, (target_rows // (unit * T)) * unit)
    G = -(-B // Bb)
    if G > 1 and G % 2:
        G += 1                          # even grid -> both v7x TensorCores busy
    return Bb, G


def grn_layers(a_in_m, a_out_m, h0, fixed_pre, seq_mask, u_stacked, num_layers):
    """a_in_m / a_out_m: [B,T,T] row-seq-masked aggregation matrices."""
    B, T, D = h0.shape
    D4 = 4 * D
    Bb, G = _choose_blocks(B, T)
    B_pad = Bb * G
    R = Bb * T
    RT = B_pad * T

    def pad_b(x):
        if B_pad == B:
            return x
        pad = [(0, B_pad - B)] + [(0, 0)] * (x.ndim - 1)
        return jnp.pad(x, pad)

    # Block-diagonal, pre-transposed aggregation operator per grid block:
    #   M[g, b*T+s, c*T+t] = delta(b, c) * A[g*Bb+b, t, s]
    def blockdiag_t(a):
        a4 = pad_b(a).reshape(G, Bb, T, T)
        eye = jnp.eye(Bb, dtype=a.dtype)
        return jnp.einsum('gbts,bc->gbsct', a4, eye).reshape(G, R, R)

    a_cat = jnp.concatenate([blockdiag_t(a_in_m), blockdiag_t(a_out_m)],
                            axis=-1).astype(jnp.bfloat16)            # [G, R, 2R]

    # Feature-major (rows-on-lanes) operands; transposes stay in the wrapper.
    h0_t = pad_b(h0).reshape(RT, D).T                                 # [D, RT]
    fpre_t = pad_b(fixed_pre).reshape(RT, D4).T                       # [4D, RT]
    mask_t = pad_b(seq_mask).astype(jnp.float32).reshape(1, RT)       # [1, RT]
    u_t = u_stacked.T.astype(jnp.bfloat16)                            # [4D, 2D]

    kernel = functools.partial(_grn_fused_kernel, num_layers=num_layers,
                               hidden_dim=D)
    reps_t, c_t = pl.pallas_call(
        kernel,
        out_shape=(jax.ShapeDtypeStruct((num_layers, D, RT), jnp.float32),
                   jax.ShapeDtypeStruct((D, RT), jnp.float32)),
        grid=(G,),
        in_specs=[pl.BlockSpec((1, R, 2 * R), lambda g: (g, 0, 0)),
                  pl.BlockSpec((D, R), lambda g: (0, g)),
                  pl.BlockSpec((D4, R), lambda g: (0, g)),
                  pl.BlockSpec((1, R), lambda g: (0, g)),
                  pl.BlockSpec((D4, 2 * D), lambda g: (0, 0))],
        out_specs=(pl.BlockSpec((num_layers, D, R), lambda g: (0, 0, g)),
                   pl.BlockSpec((D, R), lambda g: (0, g))),
        compiler_params=pltpu.CompilerParams(
            dimension_semantics=("parallel",),
            vmem_limit_bytes=32 * 1024 * 1024),
    )(a_cat, h0_t, fpre_t, mask_t, u_t)

    # Back to [L, B, T, D] / [B, T, D] outside the kernel.
    reps = reps_t.reshape(num_layers, D, B_pad, T)[:, :, :B].transpose(0, 2, 3, 1)
    c_final = c_t.reshape(D, B_pad, T)[:, :B].transpose(1, 2, 0)
    return reps, c_final


# ----------------------------------------------------------------------------
# GRN forward (glue in JAX, recurrent hot path in the Pallas kernel above).
# ----------------------------------------------------------------------------
def grn_forward(params, word_repres, sentence_repres, seq_mask,
                in_idx, in_edges, in_mask, out_idx, out_edges, out_mask,
                num_graph_layer):
    B, T, _ = word_repres.shape
    edge_emb = params["edge_embedding"]

    def precompute(idx, edges, nmask):
        # A[b,t,s] = sum_n nmask[b,t,n] * 1[idx[b,t,n] == s]   (scatter-add)
        bi = jnp.broadcast_to(jnp.arange(B)[:, None, None], idx.shape)
        ti = jnp.broadcast_to(jnp.arange(T)[None, :, None], idx.shape)
        A = jnp.zeros((B, T, T), jnp.float32).at[bi, ti, idx].add(nmask)
        e = edge_emb[edges]                                        # [B,T,N,E]
        E_sum = jnp.einsum('btne,btn->bte', e, nmask)
        return A, E_sum

    A_in, E_in = precompute(in_idx, in_edges, in_mask)
    A_out, E_out = precompute(out_idx, out_edges, out_mask)
    m3 = seq_mask[..., None].astype(jnp.float32)

    # Fixed neighbor features: cat(word-gather-sum, edge-sum), no seq mask.
    x_in = jnp.concatenate(
        [jnp.einsum('bts,bsd->btd', A_in, word_repres), E_in], -1)
    x_out = jnp.concatenate(
        [jnp.einsum('bts,bsd->btd', A_out, word_repres), E_out], -1)

    # Layer-invariant half of the gate pre-activation, hoisted out of the
    # kernel: one stacked matmul over [x_in | x_out | E_in*m | E_out*m].
    fixed_in = jnp.concatenate([x_in, x_out, E_in * m3, E_out * m3], -1)
    W_fixed = jnp.concatenate([params["w_in"], params["w_out"],
                               params["u_in_e"], params["u_out_e"]], 0)
    fixed_pre = jnp.einsum('btk,kd->btd', fixed_in, W_fixed) + params["b"]

    # Fold the per-row seq mask into the aggregation matrices (replaces the
    # per-layer `hcat * mask` inside the kernel).  Entries stay small exact
    # integers * {0,1}, so the later bf16 cast is exact.
    A_in_m = A_in * m3
    A_out_m = A_out * m3

    # Recurrent weights for the fused in+out hidden matmul: [2D, 4D].
    U = jnp.concatenate([params["u_in_h"], params["u_out_h"]], 0)

    reps, node_cell = grn_layers(A_in_m, A_out_m, sentence_repres, fixed_pre,
                                 seq_mask, U, num_graph_layer)
    graph_representations = [reps[l] for l in range(num_graph_layer)]
    return graph_representations, reps[num_graph_layer - 1], node_cell


# ----------------------------------------------------------------------------
# Pure-JAX reference (mirrors the PyTorch forward semantics) for validation.
# ----------------------------------------------------------------------------
def collect_neighbor(rep, positions):
    B = positions.shape[0]
    bidx = jnp.arange(B)[:, None, None]
    return rep[bidx, positions]                                      # [B,T,N,D]


def grn_reference(params, word_repres, sentence_repres, seq_mask,
                  in_idx, in_edges, in_mask, out_idx, out_edges, out_mask,
                  num_graph_layer):
    edge_emb = params["edge_embedding"]
    D = params["b"].shape[-1] // 4
    B, T, _ = word_repres.shape
    m3 = seq_mask[..., None].astype(jnp.float32)

    in_edge_rep = edge_emb[in_edges]
    out_edge_rep = edge_emb[out_edges]
    in_rep = (jnp.concatenate([collect_neighbor(word_repres, in_idx),
                               in_edge_rep], -1) * in_mask[..., None]).sum(2)
    out_rep = (jnp.concatenate([collect_neighbor(word_repres, out_idx),
                                out_edge_rep], -1) * out_mask[..., None]).sum(2)

    W_in, W_out = params["w_in"], params["w_out"]
    U_in = jnp.concatenate([params["u_in_h"], params["u_in_e"]], 0)
    U_out = jnp.concatenate([params["u_out_h"], params["u_out_e"]], 0)
    b = params["b"]

    h = sentence_repres
    c = jnp.zeros((B, T, D), jnp.float32)
    reps = []
    for _ in range(num_graph_layer):
        in_prev = (jnp.concatenate([collect_neighbor(h, in_idx), in_edge_rep],
                                   -1) * in_mask[..., None]).sum(2) * m3
        out_prev = (jnp.concatenate([collect_neighbor(h, out_idx),
                                     out_edge_rep], -1)
                    * out_mask[..., None]).sum(2) * m3
        pre = (in_rep @ W_in + in_prev @ U_in + out_rep @ W_out
               + out_prev @ U_out + b)
        ig = jax.nn.sigmoid(pre[..., 0 * D:1 * D])
        fg = jax.nn.sigmoid(pre[..., 1 * D:2 * D])
        og = jax.nn.sigmoid(pre[..., 2 * D:3 * D])
        gc = jnp.tanh(pre[..., 3 * D:4 * D])
        c = fg * c + ig * gc
        h = og * jnp.tanh(c)
        c = c * m3
        h = h * m3
        reps.append(h)
    return reps, h, c


# ----------------------------------------------------------------------------
if __name__ == "__main__":
    key = jax.random.PRNGKey(0)
    B, T, N = 2, 8, 4
    word_dim, edge_dim, sentence_dim = 16, 8, 32
    vocab_size = 10
    num_graph_layer = 2
    WE = word_dim + edge_dim
    D4 = 4 * sentence_dim

    ks = jax.random.split(key, 20)
    scale = 0.1
    # Deterministic synthetic parameters (gate order: ingate|forget|out|cell).
    params = {
        "edge_embedding": scale * jax.random.normal(ks[0], (vocab_size, edge_dim), jnp.float32),
        "w_in":    scale * jax.random.normal(ks[1], (WE, D4), jnp.float32),
        "w_out":   scale * jax.random.normal(ks[2], (WE, D4), jnp.float32),
        "u_in_h":  scale * jax.random.normal(ks[3], (sentence_dim, D4), jnp.float32),
        "u_in_e":  scale * jax.random.normal(ks[4], (edge_dim, D4), jnp.float32),
        "u_out_h": scale * jax.random.normal(ks[5], (sentence_dim, D4), jnp.float32),
        "u_out_e": scale * jax.random.normal(ks[6], (edge_dim, D4), jnp.float32),
        "b":       scale * jax.random.normal(ks[7], (1, D4), jnp.float32),
    }

    word_repres = jax.random.normal(ks[8], (B, T, word_dim), jnp.float32)
    sentence_repres = jax.random.normal(ks[9], (B, T, sentence_dim), jnp.float32)
    seq_mask = (jax.random.uniform(ks[10], (B, T)) > 0.2).astype(jnp.float32)

    in_idx = jax.random.randint(ks[11], (B, T, N), 0, T)
    in_edges = jax.random.randint(ks[12], (B, T, N), 0, vocab_size)
    in_mask = (jax.random.uniform(ks[13], (B, T, N)) > 0.3).astype(jnp.float32)
    out_idx = jax.random.randint(ks[14], (B, T, N), 0, T)
    out_edges = jax.random.randint(ks[15], (B, T, N), 0, vocab_size)
    out_mask = (jax.random.uniform(ks[16], (B, T, N)) > 0.3).astype(jnp.float32)

    reps, h, c = grn_forward(params, word_repres, sentence_repres, seq_mask,
                             in_idx, in_edges, in_mask,
                             out_idx, out_edges, out_mask, num_graph_layer)
    jax.block_until_ready((h, c))

    reps_r, h_r, c_r = grn_reference(params, word_repres, sentence_repres,
                                     seq_mask, in_idx, in_edges, in_mask,
                                     out_idx, out_edges, out_mask,
                                     num_graph_layer)
    # Tolerance loosened for bf16 MXU operands (f32 accumulation).
    assert jnp.allclose(h, h_r, atol=2e-2, rtol=2e-2)
    assert jnp.allclose(c, c_r, atol=2e-2, rtol=2e-2)
    for a, b_ in zip(reps, reps_r):
        assert jnp.allclose(a, b_, atol=2e-2, rtol=2e-2)

    print("KERNEL_OK")
</pallas_src>

<mosaic_0001>
module attributes {stable_mosaic.version = 11 : i64} {
  func.func @_grn_fused_kernel(%arg0: i32, %arg1: memref<1x16x32xbf16, #tpu.memory_space<vmem>>, %arg2: memref<32x16xf32, #tpu.memory_space<vmem>>, %arg3: memref<128x16xf32, #tpu.memory_space<vmem>>, %arg4: memref<1x16xf32, #tpu.memory_space<vmem>>, %arg5: memref<128x64xbf16, #tpu.memory_space<vmem>>, %arg6: memref<2x32x16xf32, #tpu.memory_space<vmem>>, %arg7: memref<32x16xf32, #tpu.memory_space<vmem>>) attributes {dimension_semantics = [#tpu.dimension_semantics<parallel>], iteration_bounds = array<i64: 1>, scalar_prefetch = 0 : i64, scratch_operands = 0 : i64, tpu.core_type = #tpu.core_type<tc>, window_params = [{transform_indices = @transform_0, window_bounds = array<i64: 1, 16, 32>}, {transform_indices = @transform_1, window_bounds = array<i64: 32, 16>}, {transform_indices = @transform_2, window_bounds = array<i64: 128, 16>}, {transform_indices = @transform_3, window_bounds = array<i64: 1, 16>}, {pipeline_mode = #tpu.pipeline_mode<synchronous>, transform_indices = @transform_4, window_bounds = array<i64: 128, 64>}, {transform_indices = @transform_5, window_bounds = array<i64: 2, 32, 16>}, {transform_indices = @transform_6, window_bounds = array<i64: 32, 16>}]} {
    %c0 = arith.constant 0 : index
    %c0_0 = arith.constant 0 : index
    %c0_1 = arith.constant 0 : index
    %0 = vector.load %arg1[%c0, %c0_0, %c0_1] : memref<1x16x32xbf16, #tpu.memory_space<vmem>>, vector<1x16x32xbf16>
    %1 = vector.shape_cast %0 : vector<1x16x32xbf16> to vector<16x32xbf16>
    %c0_2 = arith.constant 0 : index
    %c0_3 = arith.constant 0 : index
    %2 = vector.load %arg5[%c0_2, %c0_3] : memref<128x64xbf16, #tpu.memory_space<vmem>>, vector<128x64xbf16>
    %c0_4 = arith.constant 0 : index
    %c0_5 = arith.constant 0 : index
    %3 = vector.load %arg3[%c0_4, %c0_5] : memref<128x16xf32, #tpu.memory_space<vmem>>, vector<128x16xf32>
    %c0_6 = arith.constant 0 : index
    %c0_7 = arith.constant 0 : index
    %4 = vector.load %arg4[%c0_6, %c0_7] : memref<1x16xf32, #tpu.memory_space<vmem>>, vector<1x16xf32>
    %5 = vector.shape_cast %4 : vector<1x16xf32> to vector<1x16xf32>
    %6 = vector.broadcast %5 : vector<1x16xf32> to vector<32x16xf32>
    %c0_8 = arith.constant 0 : index
    %c0_9 = arith.constant 0 : index
    %7 = vector.load %arg2[%c0_8, %c0_9] : memref<32x16xf32, #tpu.memory_space<vmem>>, vector<32x16xf32>
    %cst = arith.constant 0.000000e+00 : f32
    %8 = vector.broadcast %cst : f32 to vector<32x16xf32>
    %9 = arith.truncf %7 : vector<32x16xf32> to vector<32x16xbf16>
    %cst_10 = arith.constant dense<0.000000e+00> : vector<32x32xf32>
    %10 = tpu.matmul %9, %1, %cst_10 {dimension_numbers = #tpu.dot_dimension_numbers<[1], [0], [0], [1], [0, 0, 1, 1], [], []>} : vector<32x16xbf16>, vector<16x32xbf16>, vector<32x32xf32> -> vector<32x32xf32>
    %11 = vector.extract_strided_slice %10 {offsets = [0, 0], sizes = [32, 16], strides = [1, 1]} : vector<32x32xf32> to vector<32x16xf32>
    %12 = vector.extract_strided_slice %10 {offsets = [0, 16], sizes = [32, 16], strides = [1, 1]} : vector<32x32xf32> to vector<32x16xf32>
    %13 = tpu.concatenate %11, %12 in 0 : vector<32x16xf32>, vector<32x16xf32> -> vector<64x16xf32>
    %14 = arith.truncf %13 : vector<64x16xf32> to vector<64x16xbf16>
    %cst_11 = arith.constant dense<0.000000e+00> : vector<128x16xf32>
    %15 = tpu.matmul %2, %14, %cst_11 {dimension_numbers = #tpu.dot_dimension_numbers<[1], [0], [0], [1], [0, 0, 1, 1], [], []>} : vector<128x64xbf16>, vector<64x16xbf16>, vector<128x16xf32> -> vector<128x16xf32>
    %16 = arith.addf %3, %15 : vector<128x16xf32>
    %17 = vector.extract_strided_slice %16 {offsets = [0, 0], sizes = [32, 16], strides = [1, 1]} : vector<128x16xf32> to vector<32x16xf32>
    %18 = arith.negf %17 : vector<32x16xf32>
    %19 = math.exp %18 : vector<32x16xf32>
    %cst_12 = arith.constant 1.000000e+00 : f32
    %20 = vector.broadcast %cst_12 : f32 to vector<32x16xf32>
    %21 = arith.addf %20, %19 : vector<32x16xf32>
    %22 = arith.divf %20, %21 : vector<32x16xf32>
    %23 = vector.extract_strided_slice %16 {offsets = [32, 0], sizes = [32, 16], strides = [1, 1]} : vector<128x16xf32> to vector<32x16xf32>
    %24 = arith.negf %23 : vector<32x16xf32>
    %25 = math.exp %24 : vector<32x16xf32>
    %cst_13 = arith.constant 1.000000e+00 : f32
    %26 = vector.broadcast %cst_13 : f32 to vector<32x16xf32>
    %27 = arith.addf %26, %25 : vector<32x16xf32>
    %28 = arith.divf %26, %27 : vector<32x16xf32>
    %29 = vector.extract_strided_slice %16 {offsets = [64, 0], sizes = [32, 16], strides = [1, 1]} : vector<128x16xf32> to vector<32x16xf32>
    %30 = arith.negf %29 : vector<32x16xf32>
    %31 = math.exp %30 : vector<32x16xf32>
    %cst_14 = arith.constant 1.000000e+00 : f32
    %32 = vector.broadcast %cst_14 : f32 to vector<32x16xf32>
    %33 = arith.addf %32, %31 : vector<32x16xf32>
    %34 = arith.divf %32, %33 : vector<32x16xf32>
    %35 = vector.extract_strided_slice %16 {offsets = [96, 0], sizes = [32, 16], strides = [1, 1]} : vector<128x16xf32> to vector<32x16xf32>
    %36 = math.tanh %35 : vector<32x16xf32>
    %37 = arith.mulf %28, %8 : vector<32x16xf32>
    %38 = arith.mulf %22, %36 : vector<32x16xf32>
    %39 = arith.addf %37, %38 : vector<32x16xf32>
    %40 = math.tanh %39 : vector<32x16xf32>
    %41 = arith.mulf %34, %40 : vector<32x16xf32>
    %42 = arith.mulf %41, %6 : vector<32x16xf32>
    %c0_15 = arith.constant 0 : index
    %c0_16 = arith.constant 0 : index
    %c0_17 = arith.constant 0 : index
    %43 = vector.load %arg6[%c0_15, %c0_16, %c0_17] : memref<2x32x16xf32, #tpu.memory_space<vmem>>, vector<1x32x16xf32>
    %44 = vector.shape_cast %43 : vector<1x32x16xf32> to vector<32x16xf32>
    %45 = vector.shape_cast %42 : vector<32x16xf32> to vector<1x32x16xf32>
    tpu.vector_store %arg6[%c0_15, %c0_16, %c0_17], %45 {strides = array<i32>} : memref<2x32x16xf32, #tpu.memory_space<vmem>>, vector<1x32x16xf32>,
    %46 = arith.truncf %42 : vector<32x16xf32> to vector<32x16xbf16>
    %cst_18 = arith.constant dense<0.000000e+00> : vector<32x32xf32>
    %47 = tpu.matmul %46, %1, %cst_18 {dimension_numbers = #tpu.dot_dimension_numbers<[1], [0], [0], [1], [0, 0, 1, 1], [], []>} : vector<32x16xbf16>, vector<16x32xbf16>, vector<32x32xf32> -> vector<32x32xf32>
    %48 = vector.extract_strided_slice %47 {offsets = [0, 0], sizes = [32, 16], strides = [1, 1]} : vector<32x32xf32> to vector<32x16xf32>
    %49 = vector.extract_strided_slice %47 {offsets = [0, 16], sizes = [32, 16], strides = [1, 1]} : vector<32x32xf32> to vector<32x16xf32>
    %50 = tpu.concatenate %48, %49 in 0 : vector<32x16xf32>, vector<32x16xf32> -> vector<64x16xf32>
    %51 = arith.truncf %50 : vector<64x16xf32> to vector<64x16xbf16>
    %cst_19 = arith.constant dense<0.000000e+00> : vector<128x16xf32>
    %52 = tpu.matmul %2, %51, %cst_19 {dimension_numbers = #tpu.dot_dimension_numbers<[1], [0], [0], [1], [0, 0, 1, 1], [], []>} : vector<128x64xbf16>, vector<64x16xbf16>, vector<128x16xf32> -> vector<128x16xf32>
    %53 = arith.addf %3, %52 : vector<128x16xf32>
    %54 = vector.extract_strided_slice %53 {offsets = [0, 0], sizes = [32, 16], strides = [1, 1]} : vector<128x16xf32> to vector<32x16xf32>
    %55 = arith.negf %54 : vector<32x16xf32>
    %56 = math.exp %55 : vector<32x16xf32>
    %cst_20 = arith.constant 1.000000e+00 : f32
    %57 = vector.broadcast %cst_20 : f32 to vector<32x16xf32>
    %58 = arith.addf %57, %56 : vector<32x16xf32>
    %59 = arith.divf %57, %58 : vector<32x16xf32>
    %60 = vector.extract_strided_slice %53 {offsets = [32, 0], sizes = [32, 16], strides = [1, 1]} : vector<128x16xf32> to vector<32x16xf32>
    %61 = arith.negf %60 : vector<32x16xf32>
    %62 = math.exp %61 : vector<32x16xf32>
    %cst_21 = arith.constant 1.000000e+00 : f32
    %63 = vector.broadcast %cst_21 : f32 to vector<32x16xf32>
    %64 = arith.addf %63, %62 : vector<32x16xf32>
    %65 = arith.divf %63, %64 : vector<32x16xf32>
    %66 = vector.extract_strided_slice %53 {offsets = [64, 0], sizes = [32, 16], strides = [1, 1]} : vector<128x16xf32> to vector<32x16xf32>
    %67 = arith.negf %66 : vector<32x16xf32>
    %68 = math.exp %67 : vector<32x16xf32>
    %cst_22 = arith.constant 1.000000e+00 : f32
    %69 = vector.broadcast %cst_22 : f32 to vector<32x16xf32>
    %70 = arith.addf %69, %68 : vector<32x16xf32>
    %71 = arith.divf %69, %70 : vector<32x16xf32>
    %72 = vector.extract_strided_slice %53 {offsets = [96, 0], sizes = [32, 16], strides = [1, 1]} : vector<128x16xf32> to vector<32x16xf32>
    %73 = math.tanh %72 : vector<32x16xf32>
    %74 = arith.mulf %65, %39 : vector<32x16xf32>
    %75 = arith.mulf %59, %73 : vector<32x16xf32>
    %76 = arith.addf %74, %75 : vector<32x16xf32>
    %77 = math.tanh %76 : vector<32x16xf32>
    %78 = arith.mulf %71, %77 : vector<32x16xf32>
    %79 = arith.mulf %78, %6 : vector<32x16xf32>
    %c1 = arith.constant 1 : index
    %c0_23 = arith.constant 0 : index
    %c0_24 = arith.constant 0 : index
    %80 = vector.load %arg6[%c1, %c0_23, %c0_24] : memref<2x32x16xf32, #tpu.memory_space<vmem>>, vector<1x32x16xf32>
    %81 = vector.shape_cast %80 : vector<1x32x16xf32> to vector<32x16xf32>
    %82 = vector.shape_cast %79 : vector<32x16xf32> to vector<1x32x16xf32>
    tpu.vector_store %arg6[%c1, %c0_23, %c0_24], %82 {strides = array<i32>} : memref<2x32x16xf32, #tpu.memory_space<vmem>>, vector<1x32x16xf32>,
    %83 = arith.mulf %76, %6 : vector<32x16xf32>
    %c0_25 = arith.constant 0 : index
    %c0_26 = arith.constant 0 : index
    %84 = vector.load %arg7[%c0_25, %c0_26] : memref<32x16xf32, #tpu.memory_space<vmem>>, vector<32x16xf32>
    tpu.vector_store %arg7[%c0_25, %c0_26], %83 {strides = array<i32>} : memref<32x16xf32, #tpu.memory_space<vmem>>, vector<32x16xf32>,
    return
  }
  func.func @transform_0(%arg0: i32) -> (i32, i32, i32) {
    %c0_i32 = arith.constant 0 : i32
    %c0_i32_0 = arith.constant 0 : i32
    %c0_i32_1 = arith.constant 0 : i32
    return %arg0, %c0_i32, %c0_i32_0 : i32, i32, i32
  }
  func.func @transform_1(%arg0: i32) -> (i32, i32) {
    %c0_i32 = arith.constant 0 : i32
    %c0_i32_0 = arith.constant 0 : i32
    return %c0_i32, %arg0 : i32, i32
  }
  func.func @transform_2(%arg0: i32) -> (i32, i32) {
    %c0_i32 = arith.constant 0 : i32
    %c0_i32_0 = arith.constant 0 : i32
    return %c0_i32, %arg0 : i32, i32
  }
  func.func @transform_3(%arg0: i32) -> (i32, i32) {
    %c0_i32 = arith.constant 0 : i32
    %c0_i32_0 = arith.constant 0 : i32
    return %c0_i32, %arg0 : i32, i32
  }
  func.func @transform_4(%arg0: i32) -> (i32, i32) {
    %c0_i32 = arith.constant 0 : i32
    %c0_i32_0 = arith.constant 0 : i32
    %c0_i32_1 = arith.constant 0 : i32
    return %c0_i32, %c0_i32_0 : i32, i32
  }
  func.func @transform_5(%arg0: i32) -> (i32, i32, i32) {
    %c0_i32 = arith.constant 0 : i32
    %c0_i32_0 = arith.constant 0 : i32
    %c0_i32_1 = arith.constant 0 : i32
    return %c0_i32, %c0_i32_0, %arg0 : i32, i32, i32
  }
  func.func @transform_6(%arg0: i32) -> (i32, i32) {
    %c0_i32 = arith.constant 0 : i32
    %c0_i32_0 = arith.constant 0 : i32
    return %c0_i32, %arg0 : i32, i32
  }
}

</mosaic_0001>

<bundles_post_ra>
// kernel: tpu_custom_call.1
= control target key start
LH: loop header
LB: loop body
LE: loop exit
PB: predicated region body
PF: predicated region fallthrough
CT: control target
= control target key end

     0   :  { %vm76_vm0 = vcmask 130048   ;;  %vm192_vm1 = vcmask 523264   ;;  %s1375_s0 = inlined_call_operand.vmem [shape: bf16[1,16,32], index: 0, kind: input, shape index: {}]   ;;  %s1376_s1 = inlined_call_operand.vmem [shape: f32[32,16], index: 1, kind: input, shape index: {}]   ;;  %s1377_s4 = inlined_call_operand.vmem [shape: bf16[128,64], index: 4, kind: input, shape index: {}]   ;;  %s1378_s2 = inlined_call_operand.vmem [shape: f32[128,16], index: 2, kind: input, shape index: {}]   ;;  %s1379_s3 = inlined_call_operand.vmem [shape: f32[1,16], index: 3, kind: input, shape index: {}]   ;;  %s1380_s5 = inlined_call_operand.vmem [shape: f32[2,32,16], index: 5, kind: output, shape index: {0}]   ;;  %s1381_s6 = inlined_call_operand.vmem [shape: f32[32,16], index: 6, kind: output, shape index: {1}]  }
   0x1   :  { %v914_v0 = vld [vmem:[%s1375_s0] sm:$0xff]   ;;  %v65_v2 = vld [vmem:[%s1376_s1 + $0x8] sm:$0xff]  ;;  %v66_v3 = vld [vmem:[%s1376_s1 + $0x10] sm:$0xff] }
   0x2   :  { %v64_v1 = vld [vmem:[%s1376_s1] sm:$0xff]  ;;  %833 = vmatprep.subr.bf16.mxu1 %v914_v0  ;;  %v67_v5 = vld [vmem:[%s1376_s1 + $0x18] sm:$0xff]  ;;  %863 = vmatprep.subr.bf16.mxu0 %v914_v0  ;;  %s1051_s1 = smov 112   ;;  %v1116_v24 = vld [vmem:[%s1377_s4 + $0x8] sm:$0xff]  }
   0x3   :  { %v68_v4 = vpack.c.bf16 %v65_v2, %v64_v1  ;;  %834 = vmatpush3.bf16.msra.mxu1 %v914_v0  ;;  %v69_v6 = vpack.c.bf16 %v67_v5, %v66_v3  ;;  %864 = vmatpush3.bf16.msra.mxu0 %v914_v0  ;;  %v1107_v10 = vld [vmem:[%s1377_s4] sm:$0xff]   ;;  %v1121_v25 = vld [vmem:[%s1377_s4 + $0x10] sm:$0xff]   ;;  %v1130_v26 = vld [vmem:[%s1377_s4 + $0x18] sm:$0xff]  }
   0x4   :  { %v1135_v27 = vld [vmem:[%s1377_s4 + $0x20] sm:$0xff]   ;;  %v1144_v28 = vld [vmem:[%s1377_s4 + $0x28] sm:$0xff]   ;;  %v1149_v29 = vld [vmem:[%s1377_s4 + $0x30] sm:$0xff]  }
   0x5   :  { %835 = vmatprep.mubr.msk.bf16.mxu1 %vm76_vm0, %v68_v4  ;;  %v1158_v30 = vld [vmem:[%s1377_s4 + $0x38] sm:$0xff]   ;;  %v1165_v31 = vld [vmem:[%s1378_s2 + $0x10] sm:$0xff]  ;;  %v1170_v32 = vld [vmem:[%s1378_s2] sm:$0xff] }
   0x6   :  { %836 = vmatmul.mubr.msk.bf16.vlgmr.msra.gmra.mrb[0].mxu1 %vm76_vm0, %v69_v6  ;;  %v1175_v34 = vld [vmem:[%s1378_s2 + $0x18] sm:$0xff]  ;;  %v1181_v37 = vld [vmem:[%s1378_s2 + $0x8] sm:$0xff]  ;;  %v1189_v47 = vld [vmem:[%s1378_s2 + $0x30] sm:$0xff] }
   0x7   :  { %847 = vmatprep.mubr.msk.bf16.mxu1 %vm192_vm1, %v1107_v10  ;;  %v1194_v48 = vld [vmem:[%s1378_s2 + $0x20] sm:$0xff]  ;;  %v1199_v50 = vld [vmem:[%s1378_s2 + $0x38] sm:$0xff]  ;;  %v1205_v53 = vld [vmem:[%s1378_s2 + $0x28] sm:$0xff] }
   0x8   :  { %v1213_v63 = vld [vmem:[%s1378_s2 + $0x50] sm:$0xff]  ;;  %v1218_v1 = vld [vmem:[%s1378_s2 + $0x40] sm:$0xff]  ;;  %v1223_v5 = vld [vmem:[%s1378_s2 + $0x58] sm:$0xff] }
  0xd9   :  { %v837_v7 = vpop.f32.mrb[0].mxu1 }
  0xda   :  { %v117_v8 = vpop.f32.mrb[1].mxu1 }
  0xdb   :  { %v838_v9 = vpop.f32.mrb[2].mxu1 }
  0xdc   :  { %v899_v11 = vpack.i.bf16 %v838_v9, %v837_v7  ;;  %v149_v12 = vpack.c.bf16 %v838_v9, %v837_v7  ;;  %v120_v13 = vpop.f32.mrb[3].mxu1 }
  0xdd   :  { %v148_v14 = vpack.c.bf16 %v120_v13, %v117_v8  ;;  %v894_v15 = vpack.i.bf16 %v120_v13, %v117_v8 }
  0xdf   :  { %895 = vrot.lane.b32.xlu0 %v894_v15, %s1051_s1  ;;  %839 = vmatprep.subr.bf16.mxu1 %v148_v14 }
  0xe0   :  { %840 = vmatpush3.bf16.msra.mxu1 %v148_v14 }
  0xe1   :  { %841 = vmatprep.subr.bf16.mxu1 %v149_v12 }
  0xe3   :  { %900 = vrot.lane.b32.xlu0 %v899_v11, %s1051_s1  ;;  %v1229_v11 = vld [vmem:[%s1378_s2 + $0x48] sm:$0xff] }
  0xe4   :  { %842 = vmatpush3.bf16.msra.mxu1 %v149_v12 }
 0x151   :  { %v896_v16 = vpop.permute.xlu0 %895 }
 0x152   :  { %v898_v17 = vunpack.i.h.bf16 %v896_v16  ;;  %v897_v18 = vunpack.i.l.bf16 %v896_v16 }
 0x154   :  { %v150_v19 = vpack.c.bf16 %v898_v17, %v897_v18 }
 0x155   :  { %v901_v20 = vpop.permute.xlu0 %900 }
 0x156   :  { %v903_v21 = vunpack.i.h.bf16 %v901_v20  ;;  %v902_v22 = vunpack.i.l.bf16 %v901_v20  ;;  %843 = vmatprep.subr.bf16.mxu1 %v150_v19 }
 0x157   :  { %844 = vmatpush3.bf16.msra.mxu1 %v150_v19 }
 0x158   :  { %v151_v23 = vpack.c.bf16 %v903_v21, %v902_v22 }
 0x15a   :  { %845 = vmatprep.subr.bf16.mxu1 %v151_v23 }
 0x15b   :  { %846 = vmatpush3.bf16.msra.mxu1 %v151_v23 }
 0x15e   :  { %848 = vmatmul.mubr.msk.bf16.vlgmr.msra.gmra.mrb[4].mxu1 %vm192_vm1, %v1116_v24 }
 0x15f   :  { %851 = vmatprep.mubr.msk.bf16.mxu1 %vm192_vm1, %v1121_v25 }
 0x166   :  { %852 = vmatmul.mubr.msk.bf16.gmra.mrb[8].mxu1 %vm192_vm1, %v1130_v26 }
 0x167   :  { %855 = vmatprep.mubr.msk.bf16.mxu1 %vm192_vm1, %v1135_v27 }
 0x16e   :  { %856 = vmatmul.mubr.msk.bf16.gmra.mrb[12].mxu1 %vm192_vm1, %v1144_v28 }
 0x16f   :  { %859 = vmatprep.mubr.msk.bf16.mxu1 %vm192_vm1, %v1149_v29 }
 0x176   :  { %860 = vmatmul.mubr.msk.bf16.gmra.mrb[16].mxu1 %vm192_vm1, %v1158_v30 }
 0x231   :  { %v849_v33 = vpop.f32.mrb[4].mxu1 }
 0x232   :  { %v316_v35 = vadd.f32 %v849_v33, %v1165_v31  ;;  %v251_v36 = vpop.f32.mrb[5].mxu1 }
 0x233   :  { %v314_v38 = vadd.f32 %v251_v36, %v1170_v32  ;;  %v850_v39 = vpop.f32.mrb[6].mxu1 }
 0x234   :  { %v767_v40 = vmul.f32 -1.442695, %v316_v35  ;;  %v317_v41 = vadd.f32 %v850_v39, %v1175_v34  ;;  %v254_v42 = vpop.f32.mrb[7].mxu1  ;;  %v1237_v35 = vld [vmem:[%s1378_s2 + $0x70] sm:$0xff] }
 0x235   :  { %v765_v43 = vmul.f32 -1.442695, %v314_v38  ;;  %v315_v44 = vadd.f32 %v254_v42, %v1181_v37 }
 0x236   :  { %923 = vpow2.f32 %v767_v40  ;;  %v768_v45 = vmul.f32 -1.442695, %v317_v41  ;;  %v1242_v40 = vld [vmem:[%s1378_s2 + $0x60] sm:$0xff] }
 0x237   :  { %925 = vpow2.f32 %v765_v43  ;;  %v766_v46 = vmul.f32 -1.442695, %v315_v44  ;;  %v1247_v44 = vld [vmem:[%s1378_s2 + $0x78] sm:$0xff] }
 0x238   :  { %927 = vpow2.f32 %v768_v45 }
 0x239   :  { %929 = vpow2.f32 %v766_v46  ;;  %v853_v49 = vpop.f32.mrb[8].mxu1 }
 0x23a   :  { %v320_v51 = vadd.f32 %v853_v49, %v1189_v47  ;;  %v267_v52 = vpop.f32.mrb[9].mxu1 }
 0x23b   :  { %v318_v54 = vadd.f32 %v267_v52, %v1194_v48  ;;  %v854_v55 = vpop.f32.mrb[10].mxu1  ;;  %v1253_v52 = vld [vmem:[%s1378_s2 + $0x68] sm:$0xff] }
 0x23c   :  { %v771_v56 = vmul.f32 -1.442695, %v320_v51  ;;  %v321_v57 = vadd.f32 %v854_v55, %v1199_v50  ;;  %v270_v58 = vpop.f32.mrb[11].mxu1 }
 0x23d   :  { %v769_v59 = vmul.f32 -1.442695, %v318_v54  ;;  %v319_v60 = vadd.f32 %v270_v58, %v1205_v53 }
 0x23e   :  { %931 = vpow2.f32 %v771_v56  ;;  %v772_v61 = vmul.f32 -1.442695, %v321_v57 }
 0x23f   :  { %933 = vpow2.f32 %v769_v59  ;;  %v770_v62 = vmul.f32 -1.442695, %v319_v60 }
 0x240   :  { %v924_v0 = vpop.eup %923  ;;  %935 = vpow2.f32 %v772_v61 }
 0x241   :  { %v926_v2 = vpop.eup %925  ;;  %v344_v3 = vadd.f32 1.0, %v924_v0  ;;  %937 = vpow2.f32 %v770_v62  ;;  %v857_v4 = vpop.f32.mrb[12].mxu1 }
 0x242   :  { %v928_v6 = vpop.eup %927  ;;  %v342_v7 = vadd.f32 1.0, %v926_v2  ;;  %v324_v8 = vadd.f32 %v857_v4, %v1213_v63  ;;  %v283_v9 = vpop.f32.mrb[13].mxu1 }
 0x243   :  { %v930_v12 = vpop.eup %929  ;;  %939 = vrcp.f32 %v344_v3  ;;  %v345_v13 = vadd.f32 1.0, %v928_v6  ;;  %v322_v14 = vadd.f32 %v283_v9, %v1218_v1  ;;  %v858_v15 = vpop.f32.mrb[14].mxu1 }
 0x244   :  { %941 = vrcp.f32 %v342_v7  ;;  %v343_v16 = vadd.f32 1.0, %v930_v12  ;;  %v775_v17 = vmul.f32 -1.442695, %v324_v8  ;;  %v325_v18 = vadd.f32 %v858_v15, %v1223_v5  ;;  %v286_v19 = vpop.f32.mrb[15].mxu1 }
 0x245   :  { %943 = vrcp.f32 %v345_v13  ;;  %v773_v20 = vmul.f32 -1.442695, %v322_v14  ;;  %v323_v21 = vadd.f32 %v286_v19, %v1229_v11 }
 0x246   :  { %945 = vrcp.f32 %v343_v16  ;;  %v776_v22 = vmul.f32 -1.442695, %v325_v18 }
 0x247   :  { %947 = vpow2.f32 %v775_v17  ;;  %v774_v23 = vmul.f32 -1.442695, %v323_v21 }
 0x248   :  { %v932_v33 = vpop.eup %931  ;;  %949 = vpow2.f32 %v773_v20 }
 0x249   :  { %v934_v36 = vpop.eup %933  ;;  %v368_v38 = vadd.f32 1.0, %v932_v33  ;;  %951 = vpow2.f32 %v776_v22  ;;  %v861_v39 = vpop.f32.mrb[16].mxu1 }
 0x24a   :  { %v936_v41 = vpop.eup %935  ;;  %v366_v42 = vadd.f32 1.0, %v934_v36  ;;  %953 = vpow2.f32 %v774_v23  ;;  %v299_v43 = vpop.f32.mrb[17].mxu1  ;;  %v328_v49 = vadd.f32 %v861_v39, %v1237_v35 }
 0x24b   :  { %v938_v45 = vpop.eup %937  ;;  %955 = vrcp.f32 %v368_v38  ;;  %v369_v46 = vadd.f32 1.0, %v936_v41  ;;  %v862_v51 = vpop.f32.mrb[18].mxu1  ;;  %v326_v55 = vadd.f32 %v299_v43, %v1242_v40 }
 0x24c   :  { %957 = vrcp.f32 %v366_v42  ;;  %v367_v54 = vadd.f32 1.0, %v938_v45  ;;  %v302_v56 = vpop.f32.mrb[19].mxu1  ;;  %v329_v58 = vadd.f32 %v862_v51, %v1247_v44 }
 0x24d   :  { %v940_v57 = vpop.eup %939  ;;  %959 = vrcp.f32 %v369_v46  ;;  %v327_v60 = vadd.f32 %v302_v56, %v1253_v52  ;;  %v1273_v56 = vld [vmem:[%s1379_s3] ss:$0 sm:$0xff] }
 0x24e   :  { %v942_v59 = vpop.eup %941  ;;  %961 = vrcp.f32 %v367_v54 }
 0x24f   :  { %v944_v61 = vpop.eup %943  ;;  %963 = vtanh.f32 %v328_v49 }
 0x250   :  { %v946_v62 = vpop.eup %945  ;;  %965 = vtanh.f32 %v326_v55 }
 0x251   :  { %v948_v0 = vpop.eup %947  ;;  %967 = vtanh.f32 %v329_v58 }
 0x252   :  { %v950_v2 = vpop.eup %949  ;;  %969 = vtanh.f32 %v327_v60  ;;  %v392_v8 = vadd.f32 1.0, %v948_v0 }
 0x253   :  { %v952_v3 = vpop.eup %951  ;;  %v390_v12 = vadd.f32 1.0, %v950_v2 }
 0x254   :  { %v954_v4 = vpop.eup %953  ;;  %v393_v15 = vadd.f32 1.0, %v952_v3  ;;  %971 = vrcp.f32 %v392_v8 }
 0x255   :  { %v956_v6 = vpop.eup %955  ;;  %v391_v18 = vadd.f32 1.0, %v954_v4  ;;  %973 = vrcp.f32 %v390_v12 }
 0x256   :  { %v958_v7 = vpop.eup %957  ;;  %v408_v14 = vmul.f32 0.0, %v956_v6  ;;  %975 = vrcp.f32 %v393_v15 }
 0x257   :  { %v960_v9 = vpop.eup %959  ;;  %v406_v17 = vmul.f32 0.0, %v958_v7  ;;  %977 = vrcp.f32 %v391_v18 }
 0x258   :  { %v962_v13 = vpop.eup %961  ;;  %v409_v20 = vmul.f32 0.0, %v960_v9 }
 0x259   :  { %v964_v16 = vpop.eup %963  ;;  %v407_v23 = vmul.f32 0.0, %v962_v13 }
 0x25a   :  { %v966_v19 = vpop.eup %965  ;;  %v412_v21 = vmul.f32 %v964_v16, %v940_v57 }
 0x25b   :  { %v968_v22 = vpop.eup %967  ;;  %v410_v33 = vmul.f32 %v966_v19, %v942_v59 }
 0x25c   :  { %v970_v36 = vpop.eup %969  ;;  %v1258_v38 = vadd.f32 %v412_v21, %v408_v14  ;;  %v413_v39 = vmul.f32 %v968_v22, %v944_v61 }
 0x25d   :  { %v1260_v41 = vadd.f32 %v410_v33, %v406_v17  ;;  %v411_v42 = vmul.f32 %v970_v36, %v946_v62 }
 0x25e   :  { %979 = vtanh.f32 %v1258_v38  ;;  %v1263_v43 = vadd.f32 %v413_v39, %v409_v20  ;;  %v972_v46 = vpop.eup %971 }
 0x25f   :  { %981 = vtanh.f32 %v1260_v41  ;;  %v1266_v45 = vadd.f32 %v411_v42, %v407_v23  ;;  %v974_v49 = vpop.eup %973 }
 0x260   :  { %983 = vtanh.f32 %v1263_v43  ;;  %v976_v51 = vpop.eup %975 }
 0x261   :  { %985 = vtanh.f32 %v1266_v45  ;;  %v978_v54 = vpop.eup %977 }
 0x268   :  { %v980_v55 = vpop.eup %979 }
 0x269   :  { %v982_v57 = vpop.eup %981  ;;  %v424_v58 = vmul.f32 %v980_v55, %v972_v46 }
 0x26a   :  { %v984_v59 = vpop.eup %983  ;;  %v422_v60 = vmul.f32 %v982_v57, %v974_v49 }
 0x26b   :  { %v986_v61 = vpop.eup %985  ;;  %v425_v62 = vmul.f32 %v984_v59, %v976_v51  ;;  %v428_v0 = vmul.f32 %v1273_v56, %v424_v58 }
 0x26c   :  { %v423_v2 = vmul.f32 %v986_v61, %v978_v54  ;;  %v426_v3 = vmul.f32 %v1273_v56, %v422_v60 }
 0x26d   :  { %v429_v4 = vmul.f32 %v1273_v56, %v425_v62  ;;  %432 = vst.msk [vmem:[%s1380_s5 + $0x10] sm:$0xff] %vm76_vm0, %v428_v0 }
 0x26e   :  { %v427_v6 = vmul.f32 %v1273_v56, %v423_v2  ;;  %430 = vst.msk [vmem:[%s1380_s5] sm:$0xff] %vm76_vm0, %v426_v3 }
 0x26f   :  { %433 = vst.msk [vmem:[%s1380_s5 + $0x18] sm:$0xff] %vm76_vm0, %v429_v4  ;;  %v435_v7 = vpack.c.bf16 %v429_v4, %v428_v0 }
 0x270   :  { %431 = vst.msk [vmem:[%s1380_s5 + $0x8] sm:$0xff] %vm76_vm0, %v427_v6  ;;  %v434_v8 = vpack.c.bf16 %v427_v6, %v426_v3 }
 0x272   :  { %865 = vmatprep.mubr.msk.bf16.mxu0 %vm76_vm0, %v434_v8 }
 0x273   :  { %866 = vmatmul.mubr.msk.bf16.vlgmr.msra.gmra.mrb[0].mxu0 %vm76_vm0, %v435_v7 }
 0x274   :  { %877 = vmatprep.mubr.msk.bf16.mxu0 %vm192_vm1, %v1107_v10 }
 0x346   :  { %v867_v9 = vpop.f32.mrb[0].mxu0 }
 0x347   :  { %v476_v12 = vpop.f32.mrb[1].mxu0 }
 0x348   :  { %v868_v13 = vpop.f32.mrb[2].mxu0 }
 0x349   :  { %v909_v14 = vpack.i.bf16 %v868_v13, %v867_v9  ;;  %v508_v15 = vpack.c.bf16 %v868_v13, %v867_v9  ;;  %v479_v16 = vpop.f32.mrb[3].mxu0 }
 0x34a   :  { %v507_v17 = vpack.c.bf16 %v479_v16, %v476_v12  ;;  %v904_v18 = vpack.i.bf16 %v479_v16, %v476_v12 }
 0x34c   :  { %905 = vrot.lane.b32.xlu1 %v904_v18, %s1051_s1  ;;  %869 = vmatprep.subr.bf16.mxu0 %v507_v17 }
 0x34d   :  { %870 = vmatpush3.bf16.msra.mxu0 %v507_v17 }
 0x34e   :  { %871 = vmatprep.subr.bf16.mxu0 %v508_v15 }
 0x350   :  { %910 = vrot.lane.b32.xlu1 %v909_v14, %s1051_s1 }
 0x351   :  { %872 = vmatpush3.bf16.msra.mxu0 %v508_v15 }
 0x3be   :  { %v906_v19 = vpop.permute.xlu1 %905 }
 0x3bf   :  { %v908_v20 = vunpack.i.h.bf16 %v906_v19  ;;  %v907_v21 = vunpack.i.l.bf16 %v906_v19 }
 0x3c1   :  { %v509_v10 = vpack.c.bf16 %v908_v20, %v907_v21 }
 0x3c2   :  { %v911_v22 = vpop.permute.xlu1 %910 }
 0x3c3   :  { %v913_v23 = vunpack.i.h.bf16 %v911_v22  ;;  %v912_v33 = vunpack.i.l.bf16 %v911_v22  ;;  %873 = vmatprep.subr.bf16.mxu0 %v509_v10 }
 0x3c4   :  { %874 = vmatpush3.bf16.msra.mxu0 %v509_v10 }
 0x3c5   :  { %v510_v36 = vpack.c.bf16 %v913_v23, %v912_v33 }
 0x3c7   :  { %875 = vmatprep.subr.bf16.mxu0 %v510_v36 }
 0x3c8   :  { %876 = vmatpush3.bf16.msra.mxu0 %v510_v36 }
 0x3cb   :  { %878 = vmatmul.mubr.msk.bf16.vlgmr.msra.gmra.mrb[4].mxu0 %vm192_vm1, %v1116_v24 }
 0x3cc   :  { %881 = vmatprep.mubr.msk.bf16.mxu0 %vm192_vm1, %v1121_v25 }
 0x3d3   :  { %882 = vmatmul.mubr.msk.bf16.gmra.mrb[8].mxu0 %vm192_vm1, %v1130_v26 }
 0x3d4   :  { %885 = vmatprep.mubr.msk.bf16.mxu0 %vm192_vm1, %v1135_v27 }
 0x3db   :  { %886 = vmatmul.mubr.msk.bf16.gmra.mrb[12].mxu0 %vm192_vm1, %v1144_v28 }
 0x3dc   :  { %889 = vmatprep.mubr.msk.bf16.mxu0 %vm192_vm1, %v1149_v29 }
 0x3e3   :  { %890 = vmatmul.mubr.msk.bf16.gmra.mrb[16].mxu0 %vm192_vm1, %v1158_v30 }
 0x49e   :  { %v879_v39 = vpop.f32.mrb[4].mxu0 }
 0x49f   :  { %v610_v24 = vadd.f32 %v879_v39, %v1165_v31  ;;  %v545_v42 = vpop.f32.mrb[5].mxu0 }
 0x4a0   :  { %v608_v25 = vadd.f32 %v545_v42, %v1170_v32  ;;  %v880_v46 = vpop.f32.mrb[6].mxu0 }
 0x4a1   :  { %v789_v26 = vmul.f32 -1.442695, %v610_v24  ;;  %v611_v49 = vadd.f32 %v880_v46, %v1175_v34  ;;  %v548_v27 = vpop.f32.mrb[7].mxu0 }
 0x4a2   :  { %v787_v51 = vmul.f32 -1.442695, %v608_v25  ;;  %v609_v28 = vadd.f32 %v548_v27, %v1181_v37 }
 0x4a3   :  { %987 = vpow2.f32 %v789_v26  ;;  %v790_v54 = vmul.f32 -1.442695, %v611_v49 }
 0x4a4   :  { %989 = vpow2.f32 %v787_v51  ;;  %v788_v29 = vmul.f32 -1.442695, %v609_v28 }
 0x4a5   :  { %991 = vpow2.f32 %v790_v54 }
 0x4a6   :  { %993 = vpow2.f32 %v788_v29  ;;  %v883_v30 = vpop.f32.mrb[8].mxu0 }
 0x4a7   :  { %v614_v31 = vadd.f32 %v883_v30, %v1189_v47  ;;  %v561_v55 = vpop.f32.mrb[9].mxu0 }
 0x4a8   :  { %v612_v32 = vadd.f32 %v561_v55, %v1194_v48  ;;  %v884_v57 = vpop.f32.mrb[10].mxu0 }
 0x4a9   :  { %v793_v58 = vmul.f32 -1.442695, %v614_v31  ;;  %v615_v34 = vadd.f32 %v884_v57, %v1199_v50  ;;  %v564_v59 = vpop.f32.mrb[11].mxu0 }
 0x4aa   :  { %v791_v60 = vmul.f32 -1.442695, %v612_v32  ;;  %v613_v37 = vadd.f32 %v564_v59, %v1205_v53 }
 0x4ab   :  { %995 = vpow2.f32 %v793_v58  ;;  %v794_v61 = vmul.f32 -1.442695, %v615_v34 }
 0x4ac   :  { %997 = vpow2.f32 %v791_v60  ;;  %v792_v62 = vmul.f32 -1.442695, %v613_v37 }
 0x4ad   :  { %v988_v0 = vpop.eup %987  ;;  %999 = vpow2.f32 %v794_v61 }
 0x4ae   :  { %v990_v2 = vpop.eup %989  ;;  %v638_v3 = vadd.f32 1.0, %v988_v0  ;;  %1001 = vpow2.f32 %v792_v62  ;;  %v887_v47 = vpop.f32.mrb[12].mxu0 }
 0x4af   :  { %v992_v4 = vpop.eup %991  ;;  %v636_v48 = vadd.f32 1.0, %v990_v2  ;;  %v618_v6 = vadd.f32 %v887_v47, %v1213_v63  ;;  %v577_v7 = vpop.f32.mrb[13].mxu0 }
 0x4b0   :  { %v994_v50 = vpop.eup %993  ;;  %1003 = vrcp.f32 %v638_v3  ;;  %v639_v8 = vadd.f32 1.0, %v992_v4  ;;  %v616_v53 = vadd.f32 %v577_v7, %v1218_v1  ;;  %v888_v9 = vpop.f32.mrb[14].mxu0 }
 0x4b1   :  { %1005 = vrcp.f32 %v636_v48  ;;  %v637_v12 = vadd.f32 1.0, %v994_v50  ;;  %v797_v13 = vmul.f32 -1.442695, %v618_v6  ;;  %v619_v14 = vadd.f32 %v888_v9, %v1223_v5  ;;  %v580_v15 = vpop.f32.mrb[15].mxu0 }
 0x4b2   :  { %1007 = vrcp.f32 %v639_v8  ;;  %v795_v16 = vmul.f32 -1.442695, %v616_v53  ;;  %v617_v17 = vadd.f32 %v580_v15, %v1229_v11 }
 0x4b3   :  { %1009 = vrcp.f32 %v637_v12  ;;  %v798_v18 = vmul.f32 -1.442695, %v619_v14 }
 0x4b4   :  { %1011 = vpow2.f32 %v797_v13  ;;  %v796_v63 = vmul.f32 -1.442695, %v617_v17 }
 0x4b5   :  { %v996_v19 = vpop.eup %995  ;;  %1013 = vpow2.f32 %v795_v16 }
 0x4b6   :  { %v998_v20 = vpop.eup %997  ;;  %v662_v21 = vadd.f32 1.0, %v996_v19  ;;  %1015 = vpow2.f32 %v798_v18  ;;  %v891_v1 = vpop.f32.mrb[16].mxu0 }
 0x4b7   :  { %v1000_v10 = vpop.eup %999  ;;  %v660_v22 = vadd.f32 1.0, %v998_v20  ;;  %1017 = vpow2.f32 %v796_v63  ;;  %v593_v23 = vpop.f32.mrb[17].mxu0  ;;  %v622_v36 = vadd.f32 %v891_v1, %v1237_v35 }
 0x4b8   :  { %v1002_v5 = vpop.eup %1001  ;;  %1019 = vrcp.f32 %v662_v21  ;;  %v663_v33 = vadd.f32 1.0, %v1000_v10  ;;  %v892_v11 = vpop.f32.mrb[18].mxu0  ;;  %v620_v24 = vadd.f32 %v593_v23, %v1242_v40 }
 0x4b9   :  { %1021 = vrcp.f32 %v660_v22  ;;  %v661_v39 = vadd.f32 1.0, %v1002_v5  ;;  %v596_v42 = vpop.f32.mrb[19].mxu0  ;;  %v623_v46 = vadd.f32 %v892_v11, %v1247_v44 }
 0x4ba   :  { %v1004_v25 = vpop.eup %1003  ;;  %1023 = vrcp.f32 %v663_v33  ;;  %v621_v49 = vadd.f32 %v596_v42, %v1253_v52 }
 0x4bb   :  { %v1006_v26 = vpop.eup %1005  ;;  %1025 = vrcp.f32 %v661_v39 }
 0x4bc   :  { %v1008_v27 = vpop.eup %1007  ;;  %1027 = vtanh.f32 %v622_v36 }
 0x4bd   :  { %v1010_v51 = vpop.eup %1009  ;;  %1029 = vtanh.f32 %v620_v24 }
 0x4be   :  { %v1012_v28 = vpop.eup %1011  ;;  %1031 = vtanh.f32 %v623_v46 }
 0x4bf   :  { %v1014_v35 = vpop.eup %1013  ;;  %1033 = vtanh.f32 %v621_v49  ;;  %v686_v31 = vadd.f32 1.0, %v1012_v28 }
 0x4c0   :  { %v1016_v54 = vpop.eup %1015  ;;  %v684_v32 = vadd.f32 1.0, %v1014_v35 }
 0x4c1   :  { %v1018_v29 = vpop.eup %1017  ;;  %v687_v58 = vadd.f32 1.0, %v1016_v54  ;;  %1035 = vrcp.f32 %v686_v31 }
 0x4c2   :  { %v1020_v40 = vpop.eup %1019  ;;  %v685_v59 = vadd.f32 1.0, %v1018_v29  ;;  %1037 = vrcp.f32 %v684_v32 }
 0x4c3   :  { %v1022_v30 = vpop.eup %1021  ;;  %v702_v57 = vmul.f32 %v1020_v40, %v1258_v38  ;;  %1039 = vrcp.f32 %v687_v58 }
 0x4c4   :  { %v1024_v55 = vpop.eup %1023  ;;  %v700_v34 = vmul.f32 %v1022_v30, %v1260_v41  ;;  %1041 = vrcp.f32 %v685_v59 }
 0x4c5   :  { %v1026_v44 = vpop.eup %1025  ;;  %v703_v37 = vmul.f32 %v1024_v55, %v1263_v43 }
 0x4c6   :  { %v1028_v52 = vpop.eup %1027  ;;  %v701_v0 = vmul.f32 %v1026_v44, %v1266_v45 }
 0x4c7   :  { %v1030_v60 = vpop.eup %1029  ;;  %v706_v61 = vmul.f32 %v1028_v52, %v1004_v25 }
 0x4c8   :  { %v1032_v62 = vpop.eup %1031  ;;  %v704_v2 = vmul.f32 %v1030_v60, %v1006_v26 }
 0x4c9   :  { %v1034_v3 = vpop.eup %1033  ;;  %v710_v47 = vadd.f32 %v706_v61, %v702_v57  ;;  %v707_v4 = vmul.f32 %v1032_v62, %v1008_v27 }
 0x4ca   :  { %v708_v38 = vadd.f32 %v704_v2, %v700_v34  ;;  %v705_v48 = vmul.f32 %v1034_v3, %v1010_v51 }
 0x4cb   :  { %1043 = vtanh.f32 %v710_v47  ;;  %v731_v41 = vmul.f32 %v1273_v56, %v710_v47  ;;  %v711_v6 = vadd.f32 %v707_v4, %v703_v37  ;;  %v1036_v8 = vpop.eup %1035 }
 0x4cc   :  { %1045 = vtanh.f32 %v708_v38  ;;  %v729_v43 = vmul.f32 %v1273_v56, %v708_v38  ;;  %v709_v7 = vadd.f32 %v705_v48, %v701_v0  ;;  %v1038_v53 = vpop.eup %1037 }
 0x4cd   :  { %735 = vst.msk [vmem:[%s1381_s6 + $0x10] sm:$0xff] %vm76_vm0, %v731_v41  ;;  %1047 = vtanh.f32 %v711_v6  ;;  %v732_v45 = vmul.f32 %v1273_v56, %v711_v6  ;;  %v1040_v9 = vpop.eup %1039 }
 0x4ce   :  { %733 = vst.msk [vmem:[%s1381_s6] sm:$0xff] %vm76_vm0, %v729_v43  ;;  %1049 = vtanh.f32 %v709_v7  ;;  %v730_v50 = vmul.f32 %v1273_v56, %v709_v7  ;;  %v1042_v12 = vpop.eup %1041 }
 0x4cf   :  { %736 = vst.msk [vmem:[%s1381_s6 + $0x18] sm:$0xff] %vm76_vm0, %v732_v45 }
 0x4d0   :  { %734 = vst.msk [vmem:[%s1381_s6 + $0x8] sm:$0xff] %vm76_vm0, %v730_v50 }
 0x4d5   :  { %v1044_v13 = vpop.eup %1043 }
 0x4d6   :  { %v1046_v14 = vpop.eup %1045  ;;  %v718_v15 = vmul.f32 %v1044_v13, %v1036_v8 }
 0x4d7   :  { %v1048_v16 = vpop.eup %1047  ;;  %v716_v17 = vmul.f32 %v1046_v14, %v1038_v53 }
 0x4d8   :  { %v1050_v18 = vpop.eup %1049  ;;  %v722_v63 = vmul.f32 %v1273_v56, %v718_v15  ;;  %v719_v19 = vmul.f32 %v1048_v16, %v1040_v9 }
 0x4d9   :  { %v720_v20 = vmul.f32 %v1273_v56, %v716_v17  ;;  %v717_v21 = vmul.f32 %v1050_v18, %v1042_v12 }
 0x4da   :  { %801 = vst.msk [vmem:[%s1380_s5 + $0x30] sm:$0xff] %vm76_vm0, %v722_v63  ;;  %v723_v1 = vmul.f32 %v1273_v56, %v719_v19 }
 0x4db   :  { %799 = vst.msk [vmem:[%s1380_s5 + $0x20] sm:$0xff] %vm76_vm0, %v720_v20  ;;  %v721_v10 = vmul.f32 %v1273_v56, %v717_v21 }
 0x4dc   :  { %802 = vst.msk [vmem:[%s1380_s5 + $0x38] sm:$0xff] %vm76_vm0, %v723_v1 }
 0x4dd   :  { %800 = vst.msk [vmem:[%s1380_s5 + $0x28] sm:$0xff] %vm76_vm0, %v721_v10 }

</bundles_post_ra>
